<compile_context>
chip_gen: v6e
topology: v6e:2x2x1
jax: 0.10.0
libtpu: 0.0.40
codegen_flags: <defaults>
</compile_context>

<pallas_src>
import functools

import jax
import jax.numpy as jnp
from jax.experimental import pallas as pl
from jax.experimental.pallas import tpu as pltpu


def _round_up(x, m):
    return ((x + m - 1) // m) * m


def _cdiv(a, b):
    return (a + b - 1) // b


def _vmem_capacity_bytes():
    try:
        return int(pltpu.get_tpu_info().vmem_capacity_bytes)
    except Exception:
        return 64 * 1024 * 1024  # v7x per-TC capacity: safe lower bound on all gens


def _complex_conv_kernel(x_ref, w_ref, b_ref, o_ref, *, ts, tap_offsets):
    """One (image, spatial-tile) step of the complex conv.

    x_ref: (2*Cin_p, HWin_p) bf16  whole flattened image (real rows || imag rows),
                                   W-strided lane axis, zero-padded tail.
    w_ref: (KH*KW, 2*Co, 2*Cin_p) bf16  per-tap block weights [[Wr,-Wi],[Wi,Wr]].
    b_ref: (2*Co, 1) f32           fused bias [b_r - b_i ; b_r + b_i].
    o_ref: (2*Co, TS) f32          [real ; imag] output lanes for this tile.
    """
    si = pl.program_id(1)
    base = pl.multiple_of(si * ts, 128)

    # Init with fused bias; invalid (stride-domain) lanes are discarded on host.
    o_ref[...] = jnp.broadcast_to(b_ref[...], o_ref.shape)

    # Per-tap: aligned dynamic load of a (ts + 128)-lane window, then a static
    # lane shift selects the tap; one small MXU dot accumulates into o_ref.
    for t, off in enumerate(tap_offsets):
        hi = (off // 128) * 128            # static, 128-aligned part of the shift
        lo = off - hi                      # static, < 128
        start = pl.multiple_of(base + hi, 128)
        xw = x_ref[:, pl.ds(start, ts + 128)]      # aligned dynamic lane load
        xs = xw[:, lo:lo + ts]                     # static lane shift (XLU)
        o_ref[...] += jnp.dot(w_ref[t], xs, preferred_element_type=jnp.float32)


def _plan_spatial_tiles(n, s_useful, cin2p, co2, n_taps, ext_lanes, *, max_tile=8192):
    """Pick (tile_lanes, n_tiles) for the output spatial (lane) axis."""
    s128 = _round_up(s_useful, 128)
    budget = int(_vmem_capacity_bytes() * 0.45)   # headroom for compiler scratch

    # Fixed, double-buffered per-step residents: bf16 image + bf16 weights + bias.
    img_bytes = cin2p * (s128 + ext_lanes + 128) * 2
    w_bytes = n_taps * co2 * max(cin2p, 128) * 2
    fixed = 2 * img_bytes + 2 * w_bytes + 2 * co2 * 128 * 4
    rem = max(budget - fixed, 1 << 20)

    # Per-lane streaming cost: double-buffered f32 output + bf16 tap window + temp.
    per_lane = 2 * co2 * 4 + 3 * cin2p * 2 + co2 * 4
    ts_cap = max(128, (rem // per_lane) // 128 * 128)

    ts = min(max_tile, ts_cap, s128)
    n_tiles = _cdiv(s128, ts)
    # v7x has 2 TensorCores: keep >= 2 parallel grid steps when possible.
    if n * n_tiles < 2 and s128 >= 256:
        n_tiles = 2
    # Re-balance so spatial padding per image stays < ~128 lanes per tile.
    ts = _round_up(_cdiv(s_useful, n_tiles), 128)
    return ts, n_tiles


def complex_conv2d_block(x, w_r, w_i, b_r, b_i):
    """Forward of ComplexConv2D_Block (kernel KHxKW, stride 1, padding 0,
    dilation 1, groups 1, bias True).

    x:   complex64 (N, Cin, H, W)
    w_*: float32   (Cout, Cin, KH, KW)
    b_*: float32   (Cout,)
    returns complex64 (N, Cout, H-KH+1, W-KW+1)
    """
    co, ci, kh, kw = w_r.shape
    n, _, h, w_in = x.shape
    ho, wo = h - kh + 1, w_in - kw + 1
    co2 = 2 * co
    cin2p = _round_up(2 * ci, 16)                 # bf16 sublane-pack friendly

    # ---- input: [real || imag] channel stack, flattened W-strided lane axis ----
    xr = jnp.real(x).astype(jnp.float32)
    xi = jnp.imag(x).astype(jnp.float32)
    x2 = jnp.concatenate([xr, xi], axis=1).astype(jnp.bfloat16)   # (N, 2Cin, H, W)
    x2 = x2.reshape(n, 2 * ci, h * w_in)

    # Tap offsets on the W-strided lane axis (VALID conv, stride 1):
    # output lane p = y*W + x needs input lane p + i*W + j for tap (i, j).
    tap_offsets = tuple(i * w_in + j for i in range(kh) for j in range(kw))
    max_off = tap_offsets[-1]
    ext_lanes = (max_off // 128) * 128

    # Useful output lanes (W-strided); (Ho, Wo) is sliced out on the host.
    s_useful = ho * w_in
    ts, n_tiles = _plan_spatial_tiles(n, s_useful, cin2p, co2, kh * kw, ext_lanes)
    s_pad = n_tiles * ts
    hwin_pad = s_pad + ext_lanes + 128            # covers base + hi + (ts + 128)

    x2 = jnp.pad(x2, ((0, 0), (0, cin2p - 2 * ci), (0, hwin_pad - h * w_in)))

    # ---- per-tap block weights [[Wr, -Wi], [Wi, Wr]] : (KH*KW, 2Co, 2Cin_p) ----
    wr = w_r.astype(jnp.float32).transpose(2, 3, 0, 1).reshape(kh * kw, co, ci)
    wi = w_i.astype(jnp.float32).transpose(2, 3, 0, 1).reshape(kh * kw, co, ci)
    w_blk = jnp.concatenate(
        [jnp.concatenate([wr, -wi], axis=2),
         jnp.concatenate([wi, wr], axis=2)], axis=1)              # (T, 2Co, 2Cin)
    w_blk = jnp.pad(w_blk, ((0, 0), (0, 0), (0, cin2p - 2 * ci))).astype(jnp.bfloat16)

    # Fused bias: real rows get (b_r - b_i), imag rows get (b_r + b_i).
    b_blk = jnp.concatenate([b_r - b_i, b_r + b_i]).astype(jnp.float32).reshape(co2, 1)

    vmem_limit = min(int(_vmem_capacity_bytes() * 0.7), 112 * 1024 * 1024)
    kernel = functools.partial(_complex_conv_kernel, ts=ts, tap_offsets=tap_offsets)

    out = pl.pallas_call(
        kernel,
        out_shape=jax.ShapeDtypeStruct((n, co2, s_pad), jnp.float32),
        grid=(n, n_tiles),
        in_specs=[
            # Whole image stays resident in VMEM while the spatial tiles sweep.
            # TODO(synk): for images too large for VMEM residency, stream row
            # blocks + (KH-1)-row halo via manual make_async_copy double-buffering.
            pl.BlockSpec((None, cin2p, hwin_pad), lambda ni, si: (ni, 0, 0)),
            # Grid-invariant weights / bias (fetched once; bytes are counted in
            # the tile budget so double buffering cannot OOM v7x's 64 MiB VMEM).
            # TODO(synk): single-buffer these via pipeline_mode=pl.Buffered(1)
            # and add a 2*Co grid axis if Cout grows to production sizes.
            pl.BlockSpec((kh * kw, co2, cin2p), lambda ni, si: (0, 0, 0)),
            pl.BlockSpec((co2, 1), lambda ni, si: (0, 0)),
        ],
        out_specs=pl.BlockSpec((None, co2, ts), lambda ni, si: (ni, 0, si)),
        compiler_params=pltpu.CompilerParams(
            dimension_semantics=("parallel", "parallel"),
            vmem_limit_bytes=vmem_limit),
    )(x2, w_blk, b_blk)

    # Lane slice + straight reshape to NCHW (no transpose passes).
    out = out[:, :, :s_useful].reshape(n, co2, ho, w_in)[:, :, :, :wo]
    return jax.lax.complex(out[:, :co], out[:, co:])


# ---- pure-JAX reference (for correctness check only) ----
def _ref_conv(x, w, b):
    y = jax.lax.conv_general_dilated(
        x, w, window_strides=(1, 1), padding="VALID",
        dimension_numbers=("NCHW", "OIHW", "NCHW"),
        precision=jax.lax.Precision.HIGHEST)
    return y + b.reshape(1, -1, 1, 1)


def _ref_complex_conv(x, w_r, w_i, b_r, b_i):
    xr, xi = jnp.real(x), jnp.imag(x)
    real = _ref_conv(xr, w_r, b_r) - _ref_conv(xi, w_i, b_i)
    imag = _ref_conv(xi, w_r, b_r) + _ref_conv(xr, w_i, b_i)
    return real + 1j * imag


if __name__ == "__main__":
    key = jax.random.PRNGKey(0)
    N, Cin, H, W = 2, 4, 16, 16
    Cout, K = 8, 3

    k1, k2, k3, k4, k5, k6 = jax.random.split(key, 6)
    # Deterministic init mimicking nn.Conv2d's uniform(-1/sqrt(fan_in), ..)
    fan_in = Cin * K * K
    bound = 1.0 / (fan_in ** 0.5)
    w_r = jax.random.uniform(k1, (Cout, Cin, K, K), jnp.float32, -bound, bound)
    w_i = jax.random.uniform(k2, (Cout, Cin, K, K), jnp.float32, -bound, bound)
    b_r = jax.random.uniform(k3, (Cout,), jnp.float32, -bound, bound)
    b_i = jax.random.uniform(k4, (Cout,), jnp.float32, -bound, bound)

    xr = jax.random.normal(k5, (N, Cin, H, W), jnp.float32)
    xi = jax.random.normal(k6, (N, Cin, H, W), jnp.float32)
    x = xr + 1j * xi  # complex64, NCHW

    fwd = jax.jit(complex_conv2d_block)
    out = jax.block_until_ready(fwd(x, w_r, w_i, b_r, b_i))

    ref = _ref_complex_conv(x, w_r, w_i, b_r, b_i)
    assert out.shape == (N, Cout, H - K + 1, W - K + 1), out.shape
    assert out.dtype == jnp.complex64, out.dtype
    # bf16 input/weight streams with f32 accumulation -> relaxed tolerance.
    assert jnp.allclose(out, ref, atol=5e-2, rtol=5e-2), (
        float(jnp.max(jnp.abs(out - ref))))
    print("KERNEL_OK")
</pallas_src>

<mosaic_0001>
module attributes {stable_mosaic.version = 11 : i64} {
  func.func @_complex_conv_kernel(%arg0: i32, %arg1: i32, %arg2: memref<1x16x384xbf16, #tpu.memory_space<vmem>>, %arg3: memref<9x16x16xbf16, #tpu.memory_space<vmem>>, %arg4: memref<16x1xf32, #tpu.memory_space<vmem>>, %arg5: memref<1x16x256xf32, #tpu.memory_space<vmem>>) attributes {dimension_semantics = [#tpu.dimension_semantics<parallel>, #tpu.dimension_semantics<parallel>], iteration_bounds = array<i64: 2, 1>, scalar_prefetch = 0 : i64, scratch_operands = 0 : i64, tpu.core_type = #tpu.core_type<tc>, window_params = [{transform_indices = @transform_0, window_bounds = array<i64: 1, 16, 384>}, {pipeline_mode = #tpu.pipeline_mode<synchronous>, transform_indices = @transform_1, window_bounds = array<i64: 9, 16, 16>}, {pipeline_mode = #tpu.pipeline_mode<synchronous>, transform_indices = @transform_2, window_bounds = array<i64: 16, 1>}, {transform_indices = @transform_3, window_bounds = array<i64: 1, 16, 256>}]} {
    %c256_i32 = arith.constant 256 : i32
    %0 = arith.muli %arg1, %c256_i32 : i32
    %1 = tpu.assume_multiple %0, 128 : i32
    %c0 = arith.constant 0 : index
    %c0_0 = arith.constant 0 : index
    %2 = vector.load %arg4[%c0, %c0_0] : memref<16x1xf32, #tpu.memory_space<vmem>>, vector<16x1xf32>
    %3 = vector.shape_cast %2 : vector<16x1xf32> to vector<16x1xf32>
    %4 = vector.broadcast %3 : vector<16x1xf32> to vector<16x256xf32>
    %c0_1 = arith.constant 0 : index
    %c0_2 = arith.constant 0 : index
    %c0_3 = arith.constant 0 : index
    %5 = vector.load %arg5[%c0_1, %c0_2, %c0_3] : memref<1x16x256xf32, #tpu.memory_space<vmem>>, vector<1x16x256xf32>
    %6 = vector.shape_cast %5 : vector<1x16x256xf32> to vector<16x256xf32>
    %7 = vector.shape_cast %4 : vector<16x256xf32> to vector<1x16x256xf32>
    tpu.vector_store %arg5[%c0_1, %c0_2, %c0_3], %7 {strides = array<i32>} : memref<1x16x256xf32, #tpu.memory_space<vmem>>, vector<1x16x256xf32>,
    %c0_i32 = arith.constant 0 : i32
    %8 = arith.addi %1, %c0_i32 : i32
    %9 = tpu.assume_multiple %8, 128 : i32
    %c0_4 = arith.constant 0 : index
    %c0_5 = arith.constant 0 : index
    %10 = arith.index_cast %9 : i32 to index
    %11 = vector.load %arg2[%c0_4, %c0_5, %10] : memref<1x16x384xbf16, #tpu.memory_space<vmem>>, vector<1x16x384xbf16>
    %12 = vector.shape_cast %11 : vector<1x16x384xbf16> to vector<16x384xbf16>
    %13 = vector.extract_strided_slice %12 {offsets = [0, 0], sizes = [16, 256], strides = [1, 1]} : vector<16x384xbf16> to vector<16x256xbf16>
    %c0_6 = arith.constant 0 : index
    %c0_7 = arith.constant 0 : index
    %c0_8 = arith.constant 0 : index
    %14 = vector.load %arg5[%c0_6, %c0_7, %c0_8] : memref<1x16x256xf32, #tpu.memory_space<vmem>>, vector<1x16x256xf32>
    %15 = vector.shape_cast %14 : vector<1x16x256xf32> to vector<16x256xf32>
    %c0_9 = arith.constant 0 : index
    %c0_10 = arith.constant 0 : index
    %c0_11 = arith.constant 0 : index
    %16 = vector.load %arg3[%c0_9, %c0_10, %c0_11] : memref<9x16x16xbf16, #tpu.memory_space<vmem>>, vector<1x16x16xbf16>
    %17 = vector.shape_cast %16 : vector<1x16x16xbf16> to vector<16x16xbf16>
    %cst = arith.constant dense<0.000000e+00> : vector<16x256xf32>
    %18 = tpu.matmul %17, %13, %cst {dimension_numbers = #tpu.dot_dimension_numbers<[1], [0], [0], [1], [0, 0, 1, 1], [], []>} : vector<16x16xbf16>, vector<16x256xbf16>, vector<16x256xf32> -> vector<16x256xf32>
    %19 = arith.addf %15, %18 : vector<16x256xf32>
    %c0_12 = arith.constant 0 : index
    %c0_13 = arith.constant 0 : index
    %c0_14 = arith.constant 0 : index
    %20 = vector.load %arg5[%c0_12, %c0_13, %c0_14] : memref<1x16x256xf32, #tpu.memory_space<vmem>>, vector<1x16x256xf32>
    %21 = vector.shape_cast %20 : vector<1x16x256xf32> to vector<16x256xf32>
    %22 = vector.shape_cast %19 : vector<16x256xf32> to vector<1x16x256xf32>
    tpu.vector_store %arg5[%c0_12, %c0_13, %c0_14], %22 {strides = array<i32>} : memref<1x16x256xf32, #tpu.memory_space<vmem>>, vector<1x16x256xf32>,
    %c0_i32_15 = arith.constant 0 : i32
    %23 = arith.addi %1, %c0_i32_15 : i32
    %24 = tpu.assume_multiple %23, 128 : i32
    %c0_16 = arith.constant 0 : index
    %c0_17 = arith.constant 0 : index
    %25 = arith.index_cast %24 : i32 to index
    %26 = vector.load %arg2[%c0_16, %c0_17, %25] : memref<1x16x384xbf16, #tpu.memory_space<vmem>>, vector<1x16x384xbf16>
    %27 = vector.shape_cast %26 : vector<1x16x384xbf16> to vector<16x384xbf16>
    %28 = vector.extract_strided_slice %27 {offsets = [0, 1], sizes = [16, 256], strides = [1, 1]} : vector<16x384xbf16> to vector<16x256xbf16>
    %c0_18 = arith.constant 0 : index
    %c0_19 = arith.constant 0 : index
    %c0_20 = arith.constant 0 : index
    %29 = vector.load %arg5[%c0_18, %c0_19, %c0_20] : memref<1x16x256xf32, #tpu.memory_space<vmem>>, vector<1x16x256xf32>
    %30 = vector.shape_cast %29 : vector<1x16x256xf32> to vector<16x256xf32>
    %c1 = arith.constant 1 : index
    %c0_21 = arith.constant 0 : index
    %c0_22 = arith.constant 0 : index
    %31 = vector.load %arg3[%c1, %c0_21, %c0_22] : memref<9x16x16xbf16, #tpu.memory_space<vmem>>, vector<1x16x16xbf16>
    %32 = vector.shape_cast %31 : vector<1x16x16xbf16> to vector<16x16xbf16>
    %cst_23 = arith.constant dense<0.000000e+00> : vector<16x256xf32>
    %33 = tpu.matmul %32, %28, %cst_23 {dimension_numbers = #tpu.dot_dimension_numbers<[1], [0], [0], [1], [0, 0, 1, 1], [], []>} : vector<16x16xbf16>, vector<16x256xbf16>, vector<16x256xf32> -> vector<16x256xf32>
    %34 = arith.addf %30, %33 : vector<16x256xf32>
    %c0_24 = arith.constant 0 : index
    %c0_25 = arith.constant 0 : index
    %c0_26 = arith.constant 0 : index
    %35 = vector.load %arg5[%c0_24, %c0_25, %c0_26] : memref<1x16x256xf32, #tpu.memory_space<vmem>>, vector<1x16x256xf32>
    %36 = vector.shape_cast %35 : vector<1x16x256xf32> to vector<16x256xf32>
    %37 = vector.shape_cast %34 : vector<16x256xf32> to vector<1x16x256xf32>
    tpu.vector_store %arg5[%c0_24, %c0_25, %c0_26], %37 {strides = array<i32>} : memref<1x16x256xf32, #tpu.memory_space<vmem>>, vector<1x16x256xf32>,
    %c0_i32_27 = arith.constant 0 : i32
    %38 = arith.addi %1, %c0_i32_27 : i32
    %39 = tpu.assume_multiple %38, 128 : i32
    %c0_28 = arith.constant 0 : index
    %c0_29 = arith.constant 0 : index
    %40 = arith.index_cast %39 : i32 to index
    %41 = vector.load %arg2[%c0_28, %c0_29, %40] : memref<1x16x384xbf16, #tpu.memory_space<vmem>>, vector<1x16x384xbf16>
    %42 = vector.shape_cast %41 : vector<1x16x384xbf16> to vector<16x384xbf16>
    %43 = vector.extract_strided_slice %42 {offsets = [0, 2], sizes = [16, 256], strides = [1, 1]} : vector<16x384xbf16> to vector<16x256xbf16>
    %c0_30 = arith.constant 0 : index
    %c0_31 = arith.constant 0 : index
    %c0_32 = arith.constant 0 : index
    %44 = vector.load %arg5[%c0_30, %c0_31, %c0_32] : memref<1x16x256xf32, #tpu.memory_space<vmem>>, vector<1x16x256xf32>
    %45 = vector.shape_cast %44 : vector<1x16x256xf32> to vector<16x256xf32>
    %c2 = arith.constant 2 : index
    %c0_33 = arith.constant 0 : index
    %c0_34 = arith.constant 0 : index
    %46 = vector.load %arg3[%c2, %c0_33, %c0_34] : memref<9x16x16xbf16, #tpu.memory_space<vmem>>, vector<1x16x16xbf16>
    %47 = vector.shape_cast %46 : vector<1x16x16xbf16> to vector<16x16xbf16>
    %cst_35 = arith.constant dense<0.000000e+00> : vector<16x256xf32>
    %48 = tpu.matmul %47, %43, %cst_35 {dimension_numbers = #tpu.dot_dimension_numbers<[1], [0], [0], [1], [0, 0, 1, 1], [], []>} : vector<16x16xbf16>, vector<16x256xbf16>, vector<16x256xf32> -> vector<16x256xf32>
    %49 = arith.addf %45, %48 : vector<16x256xf32>
    %c0_36 = arith.constant 0 : index
    %c0_37 = arith.constant 0 : index
    %c0_38 = arith.constant 0 : index
    %50 = vector.load %arg5[%c0_36, %c0_37, %c0_38] : memref<1x16x256xf32, #tpu.memory_space<vmem>>, vector<1x16x256xf32>
    %51 = vector.shape_cast %50 : vector<1x16x256xf32> to vector<16x256xf32>
    %52 = vector.shape_cast %49 : vector<16x256xf32> to vector<1x16x256xf32>
    tpu.vector_store %arg5[%c0_36, %c0_37, %c0_38], %52 {strides = array<i32>} : memref<1x16x256xf32, #tpu.memory_space<vmem>>, vector<1x16x256xf32>,
    %c0_i32_39 = arith.constant 0 : i32
    %53 = arith.addi %1, %c0_i32_39 : i32
    %54 = tpu.assume_multiple %53, 128 : i32
    %c0_40 = arith.constant 0 : index
    %c0_41 = arith.constant 0 : index
    %55 = arith.index_cast %54 : i32 to index
    %56 = vector.load %arg2[%c0_40, %c0_41, %55] : memref<1x16x384xbf16, #tpu.memory_space<vmem>>, vector<1x16x384xbf16>
    %57 = vector.shape_cast %56 : vector<1x16x384xbf16> to vector<16x384xbf16>
    %58 = vector.extract_strided_slice %57 {offsets = [0, 16], sizes = [16, 256], strides = [1, 1]} : vector<16x384xbf16> to vector<16x256xbf16>
    %c0_42 = arith.constant 0 : index
    %c0_43 = arith.constant 0 : index
    %c0_44 = arith.constant 0 : index
    %59 = vector.load %arg5[%c0_42, %c0_43, %c0_44] : memref<1x16x256xf32, #tpu.memory_space<vmem>>, vector<1x16x256xf32>
    %60 = vector.shape_cast %59 : vector<1x16x256xf32> to vector<16x256xf32>
    %c3 = arith.constant 3 : index
    %c0_45 = arith.constant 0 : index
    %c0_46 = arith.constant 0 : index
    %61 = vector.load %arg3[%c3, %c0_45, %c0_46] : memref<9x16x16xbf16, #tpu.memory_space<vmem>>, vector<1x16x16xbf16>
    %62 = vector.shape_cast %61 : vector<1x16x16xbf16> to vector<16x16xbf16>
    %cst_47 = arith.constant dense<0.000000e+00> : vector<16x256xf32>
    %63 = tpu.matmul %62, %58, %cst_47 {dimension_numbers = #tpu.dot_dimension_numbers<[1], [0], [0], [1], [0, 0, 1, 1], [], []>} : vector<16x16xbf16>, vector<16x256xbf16>, vector<16x256xf32> -> vector<16x256xf32>
    %64 = arith.addf %60, %63 : vector<16x256xf32>
    %c0_48 = arith.constant 0 : index
    %c0_49 = arith.constant 0 : index
    %c0_50 = arith.constant 0 : index
    %65 = vector.load %arg5[%c0_48, %c0_49, %c0_50] : memref<1x16x256xf32, #tpu.memory_space<vmem>>, vector<1x16x256xf32>
    %66 = vector.shape_cast %65 : vector<1x16x256xf32> to vector<16x256xf32>
    %67 = vector.shape_cast %64 : vector<16x256xf32> to vector<1x16x256xf32>
    tpu.vector_store %arg5[%c0_48, %c0_49, %c0_50], %67 {strides = array<i32>} : memref<1x16x256xf32, #tpu.memory_space<vmem>>, vector<1x16x256xf32>,
    %c0_i32_51 = arith.constant 0 : i32
    %68 = arith.addi %1, %c0_i32_51 : i32
    %69 = tpu.assume_multiple %68, 128 : i32
    %c0_52 = arith.constant 0 : index
    %c0_53 = arith.constant 0 : index
    %70 = arith.index_cast %69 : i32 to index
    %71 = vector.load %arg2[%c0_52, %c0_53, %70] : memref<1x16x384xbf16, #tpu.memory_space<vmem>>, vector<1x16x384xbf16>
    %72 = vector.shape_cast %71 : vector<1x16x384xbf16> to vector<16x384xbf16>
    %73 = vector.extract_strided_slice %72 {offsets = [0, 17], sizes = [16, 256], strides = [1, 1]} : vector<16x384xbf16> to vector<16x256xbf16>
    %c0_54 = arith.constant 0 : index
    %c0_55 = arith.constant 0 : index
    %c0_56 = arith.constant 0 : index
    %74 = vector.load %arg5[%c0_54, %c0_55, %c0_56] : memref<1x16x256xf32, #tpu.memory_space<vmem>>, vector<1x16x256xf32>
    %75 = vector.shape_cast %74 : vector<1x16x256xf32> to vector<16x256xf32>
    %c4 = arith.constant 4 : index
    %c0_57 = arith.constant 0 : index
    %c0_58 = arith.constant 0 : index
    %76 = vector.load %arg3[%c4, %c0_57, %c0_58] : memref<9x16x16xbf16, #tpu.memory_space<vmem>>, vector<1x16x16xbf16>
    %77 = vector.shape_cast %76 : vector<1x16x16xbf16> to vector<16x16xbf16>
    %cst_59 = arith.constant dense<0.000000e+00> : vector<16x256xf32>
    %78 = tpu.matmul %77, %73, %cst_59 {dimension_numbers = #tpu.dot_dimension_numbers<[1], [0], [0], [1], [0, 0, 1, 1], [], []>} : vector<16x16xbf16>, vector<16x256xbf16>, vector<16x256xf32> -> vector<16x256xf32>
    %79 = arith.addf %75, %78 : vector<16x256xf32>
    %c0_60 = arith.constant 0 : index
    %c0_61 = arith.constant 0 : index
    %c0_62 = arith.constant 0 : index
    %80 = vector.load %arg5[%c0_60, %c0_61, %c0_62] : memref<1x16x256xf32, #tpu.memory_space<vmem>>, vector<1x16x256xf32>
    %81 = vector.shape_cast %80 : vector<1x16x256xf32> to vector<16x256xf32>
    %82 = vector.shape_cast %79 : vector<16x256xf32> to vector<1x16x256xf32>
    tpu.vector_store %arg5[%c0_60, %c0_61, %c0_62], %82 {strides = array<i32>} : memref<1x16x256xf32, #tpu.memory_space<vmem>>, vector<1x16x256xf32>,
    %c0_i32_63 = arith.constant 0 : i32
    %83 = arith.addi %1, %c0_i32_63 : i32
    %84 = tpu.assume_multiple %83, 128 : i32
    %c0_64 = arith.constant 0 : index
    %c0_65 = arith.constant 0 : index
    %85 = arith.index_cast %84 : i32 to index
    %86 = vector.load %arg2[%c0_64, %c0_65, %85] : memref<1x16x384xbf16, #tpu.memory_space<vmem>>, vector<1x16x384xbf16>
    %87 = vector.shape_cast %86 : vector<1x16x384xbf16> to vector<16x384xbf16>
    %88 = vector.extract_strided_slice %87 {offsets = [0, 18], sizes = [16, 256], strides = [1, 1]} : vector<16x384xbf16> to vector<16x256xbf16>
    %c0_66 = arith.constant 0 : index
    %c0_67 = arith.constant 0 : index
    %c0_68 = arith.constant 0 : index
    %89 = vector.load %arg5[%c0_66, %c0_67, %c0_68] : memref<1x16x256xf32, #tpu.memory_space<vmem>>, vector<1x16x256xf32>
    %90 = vector.shape_cast %89 : vector<1x16x256xf32> to vector<16x256xf32>
    %c5 = arith.constant 5 : index
    %c0_69 = arith.constant 0 : index
    %c0_70 = arith.constant 0 : index
    %91 = vector.load %arg3[%c5, %c0_69, %c0_70] : memref<9x16x16xbf16, #tpu.memory_space<vmem>>, vector<1x16x16xbf16>
    %92 = vector.shape_cast %91 : vector<1x16x16xbf16> to vector<16x16xbf16>
    %cst_71 = arith.constant dense<0.000000e+00> : vector<16x256xf32>
    %93 = tpu.matmul %92, %88, %cst_71 {dimension_numbers = #tpu.dot_dimension_numbers<[1], [0], [0], [1], [0, 0, 1, 1], [], []>} : vector<16x16xbf16>, vector<16x256xbf16>, vector<16x256xf32> -> vector<16x256xf32>
    %94 = arith.addf %90, %93 : vector<16x256xf32>
    %c0_72 = arith.constant 0 : index
    %c0_73 = arith.constant 0 : index
    %c0_74 = arith.constant 0 : index
    %95 = vector.load %arg5[%c0_72, %c0_73, %c0_74] : memref<1x16x256xf32, #tpu.memory_space<vmem>>, vector<1x16x256xf32>
    %96 = vector.shape_cast %95 : vector<1x16x256xf32> to vector<16x256xf32>
    %97 = vector.shape_cast %94 : vector<16x256xf32> to vector<1x16x256xf32>
    tpu.vector_store %arg5[%c0_72, %c0_73, %c0_74], %97 {strides = array<i32>} : memref<1x16x256xf32, #tpu.memory_space<vmem>>, vector<1x16x256xf32>,
    %c0_i32_75 = arith.constant 0 : i32
    %98 = arith.addi %1, %c0_i32_75 : i32
    %99 = tpu.assume_multiple %98, 128 : i32
    %c0_76 = arith.constant 0 : index
    %c0_77 = arith.constant 0 : index
    %100 = arith.index_cast %99 : i32 to index
    %101 = vector.load %arg2[%c0_76, %c0_77, %100] : memref<1x16x384xbf16, #tpu.memory_space<vmem>>, vector<1x16x384xbf16>
    %102 = vector.shape_cast %101 : vector<1x16x384xbf16> to vector<16x384xbf16>
    %103 = vector.extract_strided_slice %102 {offsets = [0, 32], sizes = [16, 256], strides = [1, 1]} : vector<16x384xbf16> to vector<16x256xbf16>
    %c0_78 = arith.constant 0 : index
    %c0_79 = arith.constant 0 : index
    %c0_80 = arith.constant 0 : index
    %104 = vector.load %arg5[%c0_78, %c0_79, %c0_80] : memref<1x16x256xf32, #tpu.memory_space<vmem>>, vector<1x16x256xf32>
    %105 = vector.shape_cast %104 : vector<1x16x256xf32> to vector<16x256xf32>
    %c6 = arith.constant 6 : index
    %c0_81 = arith.constant 0 : index
    %c0_82 = arith.constant 0 : index
    %106 = vector.load %arg3[%c6, %c0_81, %c0_82] : memref<9x16x16xbf16, #tpu.memory_space<vmem>>, vector<1x16x16xbf16>
    %107 = vector.shape_cast %106 : vector<1x16x16xbf16> to vector<16x16xbf16>
    %cst_83 = arith.constant dense<0.000000e+00> : vector<16x256xf32>
    %108 = tpu.matmul %107, %103, %cst_83 {dimension_numbers = #tpu.dot_dimension_numbers<[1], [0], [0], [1], [0, 0, 1, 1], [], []>} : vector<16x16xbf16>, vector<16x256xbf16>, vector<16x256xf32> -> vector<16x256xf32>
    %109 = arith.addf %105, %108 : vector<16x256xf32>
    %c0_84 = arith.constant 0 : index
    %c0_85 = arith.constant 0 : index
    %c0_86 = arith.constant 0 : index
    %110 = vector.load %arg5[%c0_84, %c0_85, %c0_86] : memref<1x16x256xf32, #tpu.memory_space<vmem>>, vector<1x16x256xf32>
    %111 = vector.shape_cast %110 : vector<1x16x256xf32> to vector<16x256xf32>
    %112 = vector.shape_cast %109 : vector<16x256xf32> to vector<1x16x256xf32>
    tpu.vector_store %arg5[%c0_84, %c0_85, %c0_86], %112 {strides = array<i32>} : memref<1x16x256xf32, #tpu.memory_space<vmem>>, vector<1x16x256xf32>,
    %c0_i32_87 = arith.constant 0 : i32
    %113 = arith.addi %1, %c0_i32_87 : i32
    %114 = tpu.assume_multiple %113, 128 : i32
    %c0_88 = arith.constant 0 : index
    %c0_89 = arith.constant 0 : index
    %115 = arith.index_cast %114 : i32 to index
    %116 = vector.load %arg2[%c0_88, %c0_89, %115] : memref<1x16x384xbf16, #tpu.memory_space<vmem>>, vector<1x16x384xbf16>
    %117 = vector.shape_cast %116 : vector<1x16x384xbf16> to vector<16x384xbf16>
    %118 = vector.extract_strided_slice %117 {offsets = [0, 33], sizes = [16, 256], strides = [1, 1]} : vector<16x384xbf16> to vector<16x256xbf16>
    %c0_90 = arith.constant 0 : index
    %c0_91 = arith.constant 0 : index
    %c0_92 = arith.constant 0 : index
    %119 = vector.load %arg5[%c0_90, %c0_91, %c0_92] : memref<1x16x256xf32, #tpu.memory_space<vmem>>, vector<1x16x256xf32>
    %120 = vector.shape_cast %119 : vector<1x16x256xf32> to vector<16x256xf32>
    %c7 = arith.constant 7 : index
    %c0_93 = arith.constant 0 : index
    %c0_94 = arith.constant 0 : index
    %121 = vector.load %arg3[%c7, %c0_93, %c0_94] : memref<9x16x16xbf16, #tpu.memory_space<vmem>>, vector<1x16x16xbf16>
    %122 = vector.shape_cast %121 : vector<1x16x16xbf16> to vector<16x16xbf16>
    %cst_95 = arith.constant dense<0.000000e+00> : vector<16x256xf32>
    %123 = tpu.matmul %122, %118, %cst_95 {dimension_numbers = #tpu.dot_dimension_numbers<[1], [0], [0], [1], [0, 0, 1, 1], [], []>} : vector<16x16xbf16>, vector<16x256xbf16>, vector<16x256xf32> -> vector<16x256xf32>
    %124 = arith.addf %120, %123 : vector<16x256xf32>
    %c0_96 = arith.constant 0 : index
    %c0_97 = arith.constant 0 : index
    %c0_98 = arith.constant 0 : index
    %125 = vector.load %arg5[%c0_96, %c0_97, %c0_98] : memref<1x16x256xf32, #tpu.memory_space<vmem>>, vector<1x16x256xf32>
    %126 = vector.shape_cast %125 : vector<1x16x256xf32> to vector<16x256xf32>
    %127 = vector.shape_cast %124 : vector<16x256xf32> to vector<1x16x256xf32>
    tpu.vector_store %arg5[%c0_96, %c0_97, %c0_98], %127 {strides = array<i32>} : memref<1x16x256xf32, #tpu.memory_space<vmem>>, vector<1x16x256xf32>,
    %c0_i32_99 = arith.constant 0 : i32
    %128 = arith.addi %1, %c0_i32_99 : i32
    %129 = tpu.assume_multiple %128, 128 : i32
    %c0_100 = arith.constant 0 : index
    %c0_101 = arith.constant 0 : index
    %130 = arith.index_cast %129 : i32 to index
    %131 = vector.load %arg2[%c0_100, %c0_101, %130] : memref<1x16x384xbf16, #tpu.memory_space<vmem>>, vector<1x16x384xbf16>
    %132 = vector.shape_cast %131 : vector<1x16x384xbf16> to vector<16x384xbf16>
    %133 = vector.extract_strided_slice %132 {offsets = [0, 34], sizes = [16, 256], strides = [1, 1]} : vector<16x384xbf16> to vector<16x256xbf16>
    %c0_102 = arith.constant 0 : index
    %c0_103 = arith.constant 0 : index
    %c0_104 = arith.constant 0 : index
    %134 = vector.load %arg5[%c0_102, %c0_103, %c0_104] : memref<1x16x256xf32, #tpu.memory_space<vmem>>, vector<1x16x256xf32>
    %135 = vector.shape_cast %134 : vector<1x16x256xf32> to vector<16x256xf32>
    %c8 = arith.constant 8 : index
    %c0_105 = arith.constant 0 : index
    %c0_106 = arith.constant 0 : index
    %136 = vector.load %arg3[%c8, %c0_105, %c0_106] : memref<9x16x16xbf16, #tpu.memory_space<vmem>>, vector<1x16x16xbf16>
    %137 = vector.shape_cast %136 : vector<1x16x16xbf16> to vector<16x16xbf16>
    %cst_107 = arith.constant dense<0.000000e+00> : vector<16x256xf32>
    %138 = tpu.matmul %137, %133, %cst_107 {dimension_numbers = #tpu.dot_dimension_numbers<[1], [0], [0], [1], [0, 0, 1, 1], [], []>} : vector<16x16xbf16>, vector<16x256xbf16>, vector<16x256xf32> -> vector<16x256xf32>
    %139 = arith.addf %135, %138 : vector<16x256xf32>
    %c0_108 = arith.constant 0 : index
    %c0_109 = arith.constant 0 : index
    %c0_110 = arith.constant 0 : index
    %140 = vector.load %arg5[%c0_108, %c0_109, %c0_110] : memref<1x16x256xf32, #tpu.memory_space<vmem>>, vector<1x16x256xf32>
    %141 = vector.shape_cast %140 : vector<1x16x256xf32> to vector<16x256xf32>
    %142 = vector.shape_cast %139 : vector<16x256xf32> to vector<1x16x256xf32>
    tpu.vector_store %arg5[%c0_108, %c0_109, %c0_110], %142 {strides = array<i32>} : memref<1x16x256xf32, #tpu.memory_space<vmem>>, vector<1x16x256xf32>,
    return
  }
  func.func @transform_0(%arg0: i32, %arg1: i32) -> (i32, i32, i32) {
    %c0_i32 = arith.constant 0 : i32
    %c0_i32_0 = arith.constant 0 : i32
    %c0_i32_1 = arith.constant 0 : i32
    return %arg0, %c0_i32, %c0_i32_0 : i32, i32, i32
  }
  func.func @transform_1(%arg0: i32, %arg1: i32) -> (i32, i32, i32) {
    %c0_i32 = arith.constant 0 : i32
    %c0_i32_0 = arith.constant 0 : i32
    %c0_i32_1 = arith.constant 0 : i32
    %c0_i32_2 = arith.constant 0 : i32
    return %c0_i32, %c0_i32_0, %c0_i32_1 : i32, i32, i32
  }
  func.func @transform_2(%arg0: i32, %arg1: i32) -> (i32, i32) {
    %c0_i32 = arith.constant 0 : i32
    %c0_i32_0 = arith.constant 0 : i32
    %c0_i32_1 = arith.constant 0 : i32
    return %c0_i32, %c0_i32_0 : i32, i32
  }
  func.func @transform_3(%arg0: i32, %arg1: i32) -> (i32, i32, i32) {
    %c0_i32 = arith.constant 0 : i32
    %c0_i32_0 = arith.constant 0 : i32
    return %arg0, %c0_i32, %arg1 : i32, i32, i32
  }
}

</mosaic_0001>

<bundles_post_ra>
// kernel: custom-call.1
= control target key start
LH: loop header
LB: loop body
LE: loop exit
PB: predicated region body
PF: predicated region fallthrough
CT: control target
= control target key end

     0   :  { %s51_s0 = inlined_call_operand.hbm [shape: c64[2,4,16,16], index: 0, kind: input, shape index: {}]   ;;  %s52_s1 = inlined_call_operand.vmem [shape: f32[2,4,16,16], index: 1, kind: output, shape index: {}]  }
   0x1   :  { %s2_s8 = scalar_lea.hbm %s51_s0, 2048 }
   0x2   :  { %3 = vsyncpa [#allocation0], 0  ;;  %s4_s11 = sshll.u32 %s52_s1, 4  ;;  %s5_s11 = int_to_ptr.vmem [resolvable:$true] %s4_s11 }
   0x3   :  { %s20_s12 = scalar_lea.vmem %s5_s11, 2048  ;;  %p25_p1 = scmp.lt.s32.totalorder %s5_s11, %s5_s11 }
   0x4   :  { %p21_p0 = scmp.ne.s32.totalorder %s5_s11, %s20_s12  ;;  %p26_p2 = scmp.lt.s32.totalorder %s20_s12, %s20_s12 }
   0x6   :  { %p27_p3 = por %p26_p2, %p25_p1 }
   0x8   :  { %p28_p4 = pnand %p27_p3, %p21_p0 }
   0xa   :  { %31 = shalt.err (!%p28_p4)  }
   0xb   :  { %7 = dma.hbm_to_vmem [thread:$0]  %s2_s8, 2048, %s5_s11, [#allocation0] }
   0xc   :  { %33 = dma.done.wait [#allocation0], 2048  }
   0xd   :  { %34 = vsyncadd [#allocation0], 4294965248 }
   0xe   :  { %9 = vsyncpa [#allocation0], 1 }

// kernel: custom-call
= control target key start
LH: loop header
LB: loop body
LE: loop exit
PB: predicated region body
PF: predicated region fallthrough
CT: control target
= control target key end

     0   :  { %2 = vsyncpa [#allocation0], 0  ;;  %s47_s0 = inlined_call_operand.hbm [shape: c64[2,4,16,16], index: 0, kind: input, shape index: {}]   ;;  %s48_s1 = inlined_call_operand.vmem [shape: f32[2,4,16,16], index: 1, kind: output, shape index: {}]  }
   0x1   :  { %s3_s8 = sshll.u32 %s48_s1, 4  ;;  %s4_s8 = int_to_ptr.vmem [resolvable:$true] %s3_s8 }
   0x2   :  { %s17_s9 = scalar_lea.vmem %s4_s8, 2048  ;;  %p22_p1 = scmp.lt.s32.totalorder %s4_s8, %s4_s8 }
   0x3   :  { %p18_p0 = scmp.ne.s32.totalorder %s4_s8, %s17_s9  ;;  %p23_p2 = scmp.lt.s32.totalorder %s17_s9, %s17_s9 }
   0x5   :  { %p24_p3 = por %p23_p2, %p22_p1 }
   0x7   :  { %p25_p4 = pnand %p24_p3, %p18_p0 }
   0x9   :  { %28 = shalt.err (!%p25_p4)  }
   0xa   :  { %6 = dma.hbm_to_vmem [thread:$0]  %s47_s0, 2048, %s4_s8, [#allocation0] }
   0xb   :  { %29 = dma.done.wait [#allocation0], 2048  }
   0xc   :  { %30 = vsyncadd [#allocation0], 4294965248 }
   0xd   :  { %8 = vsyncpa [#allocation0], 1 }

// kernel: custom-call.2
= control target key start
LH: loop header
LB: loop body
LE: loop exit
PB: predicated region body
PF: predicated region fallthrough
CT: control target
= control target key end

     0   :  { %s812_s0 = inlined_call_operand.vmem [shape: f32[2,8,14,14], index: 0, kind: input, shape index: {}]   ;;  %s813_s2 = inlined_call_operand.vmem [shape: c64[2,8,14,14], index: 2, kind: output, shape index: {}]   ;;  %s814_s1 = inlined_call_operand.vmem [shape: f32[2,8,14,14], index: 1, kind: input, shape index: {}]  }
   0x1   :  { %v5_v0 = vld [vmem:[%s812_s0] sm:$0xff]  ;;  %v288_v1 = vld [vmem:[%s812_s0 + $0x8] sm:$0xff]  ;;  %v290_v2 = vld [vmem:[%s812_s0 + $0x10] sm:$0xff] }
   0x2   :  { %6 = vst [vmem:[%s813_s2] sm:$0xff] %v5_v0  ;;  %289 = vst [vmem:[%s813_s2 + $0x8] sm:$0xff] %v288_v1  ;;  %v292_v3 = vld [vmem:[%s812_s0 + $0x18] sm:$0xff]  ;;  %v294_v4 = vld [vmem:[%s812_s0 + $0x20] sm:$0xff] }
   0x3   :  { %291 = vst [vmem:[%s813_s2 + $0x10] sm:$0xff] %v290_v2  ;;  %v296_v5 = vld [vmem:[%s812_s0 + $0x28] sm:$0xff]  ;;  %293 = vst [vmem:[%s813_s2 + $0x18] sm:$0xff] %v292_v3  ;;  %v298_v6 = vld [vmem:[%s812_s0 + $0x30] sm:$0xff] }
   0x4   :  { %295 = vst [vmem:[%s813_s2 + $0x20] sm:$0xff] %v294_v4  ;;  %297 = vst [vmem:[%s813_s2 + $0x28] sm:$0xff] %v296_v5  ;;  %v300_v7 = vld [vmem:[%s812_s0 + $0x38] sm:$0xff]  ;;  %v302_v8 = vld [vmem:[%s812_s0 + $0x40] sm:$0xff] }
   0x5   :  { %299 = vst [vmem:[%s813_s2 + $0x30] sm:$0xff] %v298_v6  ;;  %301 = vst [vmem:[%s813_s2 + $0x38] sm:$0xff] %v300_v7  ;;  %v304_v9 = vld [vmem:[%s812_s0 + $0x48] sm:$0xff]  ;;  %v306_v10 = vld [vmem:[%s812_s0 + $0x50] sm:$0xff] }
   0x6   :  { %303 = vst [vmem:[%s813_s2 + $0x40] sm:$0xff] %v302_v8  ;;  %v308_v11 = vld [vmem:[%s812_s0 + $0x58] sm:$0xff]  ;;  %305 = vst [vmem:[%s813_s2 + $0x48] sm:$0xff] %v304_v9  ;;  %v310_v12 = vld [vmem:[%s812_s0 + $0x60] sm:$0xff] }
   0x7   :  { %307 = vst [vmem:[%s813_s2 + $0x50] sm:$0xff] %v306_v10  ;;  %309 = vst [vmem:[%s813_s2 + $0x58] sm:$0xff] %v308_v11  ;;  %v312_v13 = vld [vmem:[%s812_s0 + $0x68] sm:$0xff]  ;;  %v314_v14 = vld [vmem:[%s812_s0 + $0x70] sm:$0xff] }
   0x8   :  { %311 = vst [vmem:[%s813_s2 + $0x60] sm:$0xff] %v310_v12  ;;  %313 = vst [vmem:[%s813_s2 + $0x68] sm:$0xff] %v312_v13  ;;  %v316_v15 = vld [vmem:[%s812_s0 + $0x78] sm:$0xff]  ;;  %v318_v16 = vld [vmem:[%s812_s0 + $0x80] sm:$0xff] }
   0x9   :  { %315 = vst [vmem:[%s813_s2 + $0x70] sm:$0xff] %v314_v14  ;;  %v320_v17 = vld [vmem:[%s812_s0 + $0x88] sm:$0xff]  ;;  %317 = vst [vmem:[%s813_s2 + $0x78] sm:$0xff] %v316_v15  ;;  %v322_v18 = vld [vmem:[%s812_s0 + $0x90] sm:$0xff] }
   0xa   :  { %319 = vst [vmem:[%s813_s2 + $0x80] sm:$0xff] %v318_v16  ;;  %321 = vst [vmem:[%s813_s2 + $0x88] sm:$0xff] %v320_v17  ;;  %v324_v19 = vld [vmem:[%s812_s0 + $0x98] sm:$0xff]  ;;  %v326_v20 = vld [vmem:[%s812_s0 + $0xa0] sm:$0xff] }
   0xb   :  { %323 = vst [vmem:[%s813_s2 + $0x90] sm:$0xff] %v322_v18  ;;  %325 = vst [vmem:[%s813_s2 + $0x98] sm:$0xff] %v324_v19  ;;  %v328_v21 = vld [vmem:[%s812_s0 + $0xa8] sm:$0xff]  ;;  %v330_v22 = vld [vmem:[%s812_s0 + $0xb0] sm:$0xff] }
   0xc   :  { %327 = vst [vmem:[%s813_s2 + $0xa0] sm:$0xff] %v326_v20  ;;  %v332_v23 = vld [vmem:[%s812_s0 + $0xb8] sm:$0xff]  ;;  %329 = vst [vmem:[%s813_s2 + $0xa8] sm:$0xff] %v328_v21  ;;  %v334_v24 = vld [vmem:[%s812_s0 + $0xc0] sm:$0xff] }
   0xd   :  { %331 = vst [vmem:[%s813_s2 + $0xb0] sm:$0xff] %v330_v22  ;;  %333 = vst [vmem:[%s813_s2 + $0xb8] sm:$0xff] %v332_v23  ;;  %v336_v25 = vld [vmem:[%s812_s0 + $0xc8] sm:$0xff]  ;;  %v338_v26 = vld [vmem:[%s812_s0 + $0xd0] sm:$0xff] }
   0xe   :  { %335 = vst [vmem:[%s813_s2 + $0xc0] sm:$0xff] %v334_v24  ;;  %337 = vst [vmem:[%s813_s2 + $0xc8] sm:$0xff] %v336_v25  ;;  %v340_v27 = vld [vmem:[%s812_s0 + $0xd8] sm:$0xff]  ;;  %v342_v28 = vld [vmem:[%s812_s0 + $0xe0] sm:$0xff] }
   0xf   :  { %339 = vst [vmem:[%s813_s2 + $0xd0] sm:$0xff] %v338_v26  ;;  %v344_v29 = vld [vmem:[%s812_s0 + $0xe8] sm:$0xff]  ;;  %341 = vst [vmem:[%s813_s2 + $0xd8] sm:$0xff] %v340_v27  ;;  %v346_v30 = vld [vmem:[%s812_s0 + $0xf0] sm:$0xff] }
  0x10   :  { %343 = vst [vmem:[%s813_s2 + $0xe0] sm:$0xff] %v342_v28  ;;  %345 = vst [vmem:[%s813_s2 + $0xe8] sm:$0xff] %v344_v29  ;;  %v348_v31 = vld [vmem:[%s812_s0 + $0xf8] sm:$0xff]  ;;  %v131_v32 = vld [vmem:[%s814_s1] sm:$0xff] }
  0x11   :  { %347 = vst [vmem:[%s813_s2 + $0xf0] sm:$0xff] %v346_v30  ;;  %349 = vst [vmem:[%s813_s2 + $0xf8] sm:$0xff] %v348_v31  ;;  %v351_v33 = vld [vmem:[%s814_s1 + $0x8] sm:$0xff]  ;;  %v353_v34 = vld [vmem:[%s814_s1 + $0x10] sm:$0xff] }
  0x12   :  { %350 = vst [vmem:[%s813_s2 + $0x100] sm:$0xff] %v131_v32  ;;  %v355_v35 = vld [vmem:[%s814_s1 + $0x18] sm:$0xff]  ;;  %352 = vst [vmem:[%s813_s2 + $0x108] sm:$0xff] %v351_v33  ;;  %v357_v36 = vld [vmem:[%s814_s1 + $0x20] sm:$0xff] }
  0x13   :  { %354 = vst [vmem:[%s813_s2 + $0x110] sm:$0xff] %v353_v34  ;;  %356 = vst [vmem:[%s813_s2 + $0x118] sm:$0xff] %v355_v35  ;;  %v359_v37 = vld [vmem:[%s814_s1 + $0x28] sm:$0xff]  ;;  %v361_v38 = vld [vmem:[%s814_s1 + $0x30] sm:$0xff] }
  0x14   :  { %358 = vst [vmem:[%s813_s2 + $0x120] sm:$0xff] %v357_v36  ;;  %360 = vst [vmem:[%s813_s2 + $0x128] sm:$0xff] %v359_v37  ;;  %v363_v39 = vld [vmem:[%s814_s1 + $0x38] sm:$0xff]  ;;  %v365_v40 = vld [vmem:[%s814_s1 + $0x40] sm:$0xff] }
  0x15   :  { %362 = vst [vmem:[%s813_s2 + $0x130] sm:$0xff] %v361_v38  ;;  %v367_v41 = vld [vmem:[%s814_s1 + $0x48] sm:$0xff]  ;;  %364 = vst [vmem:[%s813_s2 + $0x138] sm:$0xff] %v363_v39  ;;  %v369_v42 = vld [vmem:[%s814_s1 + $0x50] sm:$0xff] }
  0x16   :  { %366 = vst [vmem:[%s813_s2 + $0x140] sm:$0xff] %v365_v40  ;;  %368 = vst [vmem:[%s813_s2 + $0x148] sm:$0xff] %v367_v41  ;;  %v371_v43 = vld [vmem:[%s814_s1 + $0x58] sm:$0xff]  ;;  %v373_v44 = vld [vmem:[%s814_s1 + $0x60] sm:$0xff] }
  0x17   :  { %370 = vst [vmem:[%s813_s2 + $0x150] sm:$0xff] %v369_v42  ;;  %372 = vst [vmem:[%s813_s2 + $0x158] sm:$0xff] %v371_v43  ;;  %v375_v45 = vld [vmem:[%s814_s1 + $0x68] sm:$0xff]  ;;  %v377_v46 = vld [vmem:[%s814_s1 + $0x70] sm:$0xff] }
  0x18   :  { %374 = vst [vmem:[%s813_s2 + $0x160] sm:$0xff] %v373_v44  ;;  %v379_v47 = vld [vmem:[%s814_s1 + $0x78] sm:$0xff]  ;;  %376 = vst [vmem:[%s813_s2 + $0x168] sm:$0xff] %v375_v45  ;;  %v381_v48 = vld [vmem:[%s814_s1 + $0x80] sm:$0xff] }
  0x19   :  { %378 = vst [vmem:[%s813_s2 + $0x170] sm:$0xff] %v377_v46  ;;  %380 = vst [vmem:[%s813_s2 + $0x178] sm:$0xff] %v379_v47  ;;  %v383_v49 = vld [vmem:[%s814_s1 + $0x88] sm:$0xff]  ;;  %v385_v50 = vld [vmem:[%s814_s1 + $0x90] sm:$0xff] }
  0x1a   :  { %382 = vst [vmem:[%s813_s2 + $0x180] sm:$0xff] %v381_v48  ;;  %384 = vst [vmem:[%s813_s2 + $0x188] sm:$0xff] %v383_v49  ;;  %v387_v51 = vld [vmem:[%s814_s1 + $0x98] sm:$0xff]  ;;  %v389_v52 = vld [vmem:[%s814_s1 + $0xa0] sm:$0xff] }
  0x1b   :  { %386 = vst [vmem:[%s813_s2 + $0x190] sm:$0xff] %v385_v50  ;;  %v391_v53 = vld [vmem:[%s814_s1 + $0xa8] sm:$0xff]  ;;  %388 = vst [vmem:[%s813_s2 + $0x198] sm:$0xff] %v387_v51  ;;  %v393_v54 = vld [vmem:[%s814_s1 + $0xb0] sm:$0xff] }
  0x1c   :  { %390 = vst [vmem:[%s813_s2 + $0x1a0] sm:$0xff] %v389_v52  ;;  %392 = vst [vmem:[%s813_s2 + $0x1a8] sm:$0xff] %v391_v53  ;;  %v395_v55 = vld [vmem:[%s814_s1 + $0xb8] sm:$0xff]  ;;  %v397_v56 = vld [vmem:[%s814_s1 + $0xc0] sm:$0xff] }
  0x1d   :  { %394 = vst [vmem:[%s813_s2 + $0x1b0] sm:$0xff] %v393_v54  ;;  %396 = vst [vmem:[%s813_s2 + $0x1b8] sm:$0xff] %v395_v55  ;;  %v399_v57 = vld [vmem:[%s814_s1 + $0xc8] sm:$0xff]  ;;  %v401_v58 = vld [vmem:[%s814_s1 + $0xd0] sm:$0xff] }
  0x1e   :  { %398 = vst [vmem:[%s813_s2 + $0x1c0] sm:$0xff] %v397_v56  ;;  %v403_v59 = vld [vmem:[%s814_s1 + $0xd8] sm:$0xff]  ;;  %400 = vst [vmem:[%s813_s2 + $0x1c8] sm:$0xff] %v399_v57  ;;  %v405_v60 = vld [vmem:[%s814_s1 + $0xe0] sm:$0xff] }
  0x1f   :  { %402 = vst [vmem:[%s813_s2 + $0x1d0] sm:$0xff] %v401_v58  ;;  %404 = vst [vmem:[%s813_s2 + $0x1d8] sm:$0xff] %v403_v59  ;;  %v407_v61 = vld [vmem:[%s814_s1 + $0xe8] sm:$0xff]  ;;  %v409_v62 = vld [vmem:[%s814_s1 + $0xf0] sm:$0xff] }
  0x20   :  { %406 = vst [vmem:[%s813_s2 + $0x1e0] sm:$0xff] %v405_v60  ;;  %408 = vst [vmem:[%s813_s2 + $0x1e8] sm:$0xff] %v407_v61  ;;  %v411_v63 = vld [vmem:[%s814_s1 + $0xf8] sm:$0xff] }
  0x21   :  { %410 = vst [vmem:[%s813_s2 + $0x1f0] sm:$0xff] %v409_v62  ;;  %412 = vst [vmem:[%s813_s2 + $0x1f8] sm:$0xff] %v411_v63 }

// kernel: complex_conv2d_block.1
= control target key start
LH: loop header
LB: loop body
LE: loop exit
PB: predicated region body
PF: predicated region fallthrough
CT: control target
= control target key end

     0   :  { %s1309_s12 = smov 0   ;;  %s1311_s13 = smov 0   ;;  %s1411_s0 = inlined_call_operand.vmem [shape: bf16[2,16,384], index: 0, kind: input, shape index: {}]   ;;  %s1412_s1 = inlined_call_operand.vmem [shape: bf16[9,16,16], index: 1, kind: input, shape index: {}]   ;;  %s1413_s2 = inlined_call_operand.vmem [shape: f32[16,1], index: 2, kind: input, shape index: {}]   ;;  %s1414_s3 = inlined_call_operand.vmem [shape: f32[2,16,256], index: 3, kind: output, shape index: {}]  }
   0x1   :  { %s1313_s14 = smov 0  }
   0x2 LB: > { %s25_s15 = sadd.s32 1, %s1274_s13  ;;  %p1133_p0 = scmp.ge.s32.totalorder %s1278_s14, 1  ;;  %s1278_s14 = sphi %s1313_s14, %s13_s14   ;;  %s1274_s13 = sphi %s1311_s13, %s1416_s13   ;;  %s1270_s12 = sphi %s1309_s12, %s1415_s12  }
   0x3   : > { %p27_p1 = scmp.ge.s32.totalorder %s25_s15, 2  ;;  %p151_p2 = scmp.lt.s32.totalorder %s1278_s14, 3 }
   0x5   : > { %s1418_s15 = smov (%p27_p1, %s25_s15), 0  ;;  %p152_p3 = pnand %p1133_p0, %p151_p2 }
   0x6   : > { %p179_p4 = scmp.lt.s32.totalorder (!%p152_p3), %s1270_s12, 1  ;;  %s1281_s22 = smov (!%p152_p3), 127  }
   0x7   : > { %155 = sbr.rel (%p152_p3) target bundleno = 383 (0x17f), region = 32  ;;  %s1282_s23 = smov (!%p152_p3), 126  }
   0x8   : > { %s1283_s24 = smov (!%p152_p3), 112   ;;  %s1284_s25 = smov (!%p152_p3), 111  }
   0x9   : > { %s1285_s26 = smov (!%p152_p3), 110   ;;  %s1286_s27 = smov (!%p152_p3), 96  }
   0xa   : > { %s1287_s28 = smov (!%p152_p3), 95   ;;  %s1288_s29 = smov (!%p152_p3), 94  }
   0xc   : > { %v1280_v0 = vmov 0   ;;  %s1420_s12 = smov (!%p179_p4, %s1270_s12), 1  ;;  %v1247_v2 = vld [vmem:[%s1412_s1] sm:$0xff]   ;;  %vm239_vm0 = vcmask 130048   ;;  %v197_v13 = vld [vmem:[%s1413_s2 + $0x8] sm:$0xff]  ;;  %vm329_vm1 = vcmask 1039360  }
   0xd   : > { %275 = vmatprep.mubr.bf16.mxu0 %v1280_v0  ;;  %369 = vmatprep.mubr.bf16.mxu1 %v1280_v0  ;;  %s1200_s16 = smul.u32 24, %s1420_s12  ;;  %v196_v12 = vld [vmem:[%s1413_s2] sm:$0xff]  ;;  %vm423_vm2 = vcmask 1031168   ;;  %v1248_v20 = vld [vmem:[%s1412_s1 + $0x8] sm:$0xff]   ;;  %v1249_v25 = vld [vmem:[%s1412_s1 + $0x10] sm:$0xff]   ;;  %vm517_vm3 = vcmask 916480  }
   0xe   : > { %1235 = vset.pattern.permute.xlu1 %v1280_v0  ;;  %1234 = vset.pattern.permute.xlu0 %v1280_v0  ;;  %v1250_v32 = vld [vmem:[%s1412_s1 + $0x18] sm:$0xff]   ;;  %vm611_vm4 = vcmask 908288   ;;  %v1251_v37 = vld [vmem:[%s1412_s1 + $0x20] sm:$0xff]   ;;  %vm705_vm5 = vcmask 900096   ;;  %v1252_v44 = vld [vmem:[%s1412_s1 + $0x28] sm:$0xff]   ;;  %vm799_vm6 = vcmask 785408  }
   0xf   : > { %s1337_s19 = scalar_lea.vmem %s1411_s0, %s1200_s16  ;;  %v1253_v49 = vld [vmem:[%s1412_s1 + $0x30] sm:$0xff]   ;;  %vm893_vm7 = vcmask 777216   ;;  %v1254_v56 = vld [vmem:[%s1412_s1 + $0x38] sm:$0xff]   ;;  %vm987_vm8 = vcmask 769024   ;;  %v1255_v61 = vld [vmem:[%s1412_s1 + $0x40] sm:$0xff]  }
  0x10   : > { %v1236_v1 = vld [vmem:[%s1337_s19 + $0x4] ss:$12 sps:$4 sm:$0xff]   ;;  %v1238_v3 = vld [vmem:[%s1337_s19] ss:$12 sps:$4 sm:$0xff]   ;;  %v1239_v4 = vld [vmem:[%s1337_s19 + $0x8] ss:$12 sps:$4 sm:$0xff]  }
  0x11   : > { %325 = vrot.lane.b32.xlu0 %v1236_v1, %s1281_s22  ;;  %257 = vmatprep.subr.bf16.mxu0 %v1236_v1  ;;  %v1240_v5 = vld [vmem:[%s1337_s19 + $0x8] ss:$12 sps:$4 sm:$0xff]  }
  0x12   : > { %323 = vrot.lane.b32.xlu1 %v1238_v3, %s1281_s22  ;;  %258 = vmatpush1.bf16.msra.mxu0 %v1238_v3  ;;  %v1241_v6 = vld [vmem:[%s1337_s19 + $0x8] ss:$12 sps:$4 sm:$0xff]  }
  0x13   : > { %v1242_v7 = vld [vmem:[%s1337_s19 + $0x8] ss:$12 sps:$4 sm:$0xff]  }
  0x14   : > { %v1243_v8 = vld [vmem:[%s1337_s19 + $0x8] ss:$12 sps:$4 sm:$0xff]  }
  0x15   : > { %327 = vrot.lane.b32.xlu0 %v1239_v4, %s1281_s22  ;;  %1140 = vmatmul.mubr.msk.bf16.vlgmr.msra.gmra.mxu0 %vm239_vm0, %v1247_v2  ;;  %v1244_v9 = vld [vmem:[%s1337_s19 + $0x8] ss:$12 sps:$4 sm:$0xff]  }
  0x16   : > { %419 = vrot.lane.b32.xlu1 %v1236_v1, %s1282_s23  ;;  %463 = vmatprep.mubr.bf16.mxu0 %v1280_v0  ;;  %v1245_v10 = vld [vmem:[%s1337_s19 + $0x8] ss:$12 sps:$4 sm:$0xff]  }
  0x17   : > { %v1246_v11 = vld [vmem:[%s1337_s19 + $0x8] ss:$12 sps:$4 sm:$0xff]  }
  0x19   : > { %421 = vrot.lane.b32.xlu0 %v1240_v5, %s1282_s23 }
  0x1a   : > { %417 = vrot.lane.b32.xlu1 %v1238_v3, %s1282_s23 }
  0x1d   : > { %513 = vrot.lane.b32.xlu0 %v1236_v1, %s1283_s24 }
  0x1e   : > { %515 = vrot.lane.b32.xlu1 %v1241_v6, %s1283_s24 }
  0x21   : > { %511 = vrot.lane.b32.xlu0 %v1238_v3, %s1283_s24 }
  0x22   : > { %607 = vrot.lane.b32.xlu1 %v1236_v1, %s1284_s25 }
  0x25   : > { %609 = vrot.lane.b32.xlu0 %v1242_v7, %s1284_s25 }
  0x26   : > { %605 = vrot.lane.b32.xlu1 %v1238_v3, %s1284_s25 }
  0x29   : > { %701 = vrot.lane.b32.xlu0 %v1236_v1, %s1285_s26 }
  0x2a   : > { %703 = vrot.lane.b32.xlu1 %v1243_v8, %s1285_s26 }
  0x2d   : > { %699 = vrot.lane.b32.xlu0 %v1238_v3, %s1285_s26 }
  0x2e   : > { %795 = vrot.lane.b32.xlu1 %v1236_v1, %s1286_s27 }
  0x31   : > { %797 = vrot.lane.b32.xlu0 %v1244_v9, %s1286_s27 }
  0x32   : > { %793 = vrot.lane.b32.xlu1 %v1238_v3, %s1286_s27  ;;  %s1199_s27 = sshll.u32 %s1420_s12, 5 }
  0x33   : > { %s192_s30 = scalar_lea.vmem %s1414_s3, %s1199_s27 }
  0x35   : > { %889 = vrot.lane.b32.xlu0 %v1236_v1, %s1287_s28 }
  0x36   : > { %891 = vrot.lane.b32.xlu1 %v1245_v10, %s1287_s28 }
  0x39   : > { %887 = vrot.lane.b32.xlu0 %v1238_v3, %s1287_s28 }
  0x3a   : > { %983 = vrot.lane.b32.xlu1 %v1236_v1, %s1288_s29 }
  0x3d   : > { %985 = vrot.lane.b32.xlu0 %v1246_v11, %s1288_s29 }
  0x3e   : > { %981 = vrot.lane.b32.xlu1 %v1238_v3, %s1288_s29 }
  0x41   : > { %200 = vperm.xlu0 %1234, %v196_v12  }
  0x42   : > { %205 = vperm.xlu1 %1235, %v197_v13  }
  0x83   : > { %v326_v14 = vpop.permute.xlu0 %325 }
  0x84   : > { %v324_v15 = vpop.permute.xlu1 %323 }
  0x85   : > { %v330_v19 = vsel %vm329_vm1, %v324_v15, %v326_v14 }
  0x87   : > { %v328_v16 = vpop.permute.xlu0 %327 }
  0x88   : > { %v420_v17 = vpop.permute.xlu1 %419  ;;  %v331_v18 = vsel %vm329_vm1, %v326_v14, %v328_v16 }
  0x89   : > { %351 = vmatprep.subr.bf16.mxu1 %v331_v18 }
  0x8a   : > { %352 = vmatpush1.bf16.msra.mxu1 %v330_v19 }
  0x8b   : > { %v422_v21 = vpop.permute.xlu0 %421 }
  0x8c   : > { %v418_v22 = vpop.permute.xlu1 %417  ;;  %v425_v23 = vsel %vm423_vm2, %v420_v17, %v422_v21 }
  0x8d   : > { %v424_v24 = vsel %vm423_vm2, %v418_v22, %v420_v17  ;;  %1147 = vmatmul.mubr.msk.bf16.vlgmr.msra.gmra.mxu1 %vm239_vm0, %v1248_v20  ;;  %445 = vmatprep.subr.bf16.mxu0 %v425_v23 }
  0x8e   : > { %446 = vmatpush1.bf16.msra.mxu0 %v424_v24  ;;  %557 = vmatprep.mubr.bf16.mxu1 %v1280_v0 }
  0x8f   : > { %v514_v26 = vpop.permute.xlu0 %513 }
  0x90   : > { %v516_v27 = vpop.permute.xlu1 %515 }
  0x91   : > { %1154 = vmatmul.mubr.msk.bf16.vlgmr.msra.gmra.mxu0 %vm239_vm0, %v1249_v25  ;;  %v519_v28 = vsel %vm517_vm3, %v514_v26, %v516_v27 }
  0x92   : > { %539 = vmatprep.subr.bf16.mxu1 %v519_v28  ;;  %651 = vmatprep.mubr.bf16.mxu0 %v1280_v0 }
  0x93   : > { %v512_v29 = vpop.permute.xlu0 %511 }
  0x94   : > { %v518_v30 = vsel %vm517_vm3, %v512_v29, %v514_v26  ;;  %v608_v31 = vpop.permute.xlu1 %607 }
  0x95   : > { %540 = vmatpush1.bf16.msra.mxu1 %v518_v30 }
  0x97   : > { %v610_v33 = vpop.permute.xlu0 %609 }
  0x98   : > { %1161 = vmatmul.mubr.msk.bf16.vlgmr.msra.gmra.mxu1 %vm239_vm0, %v1250_v32  ;;  %v606_v34 = vpop.permute.xlu1 %605  ;;  %v613_v35 = vsel %vm611_vm4, %v608_v31, %v610_v33 }
  0x99   : > { %v612_v36 = vsel %vm611_vm4, %v606_v34, %v608_v31  ;;  %633 = vmatprep.subr.bf16.mxu0 %v613_v35  ;;  %745 = vmatprep.mubr.bf16.mxu1 %v1280_v0 }
  0x9a   : > { %634 = vmatpush1.bf16.msra.mxu0 %v612_v36 }
  0x9b   : > { %v702_v38 = vpop.permute.xlu0 %701 }
  0x9c   : > { %v704_v39 = vpop.permute.xlu1 %703 }
  0x9d   : > { %1168 = vmatmul.mubr.msk.bf16.vlgmr.msra.gmra.mxu0 %vm239_vm0, %v1251_v37  ;;  %v707_v40 = vsel %vm705_vm5, %v702_v38, %v704_v39 }
  0x9e   : > { %727 = vmatprep.subr.bf16.mxu1 %v707_v40  ;;  %839 = vmatprep.mubr.bf16.mxu0 %v1280_v0 }
  0x9f   : > { %v700_v41 = vpop.permute.xlu0 %699 }
  0xa0   : > { %v706_v42 = vsel %vm705_vm5, %v700_v41, %v702_v38  ;;  %v796_v43 = vpop.permute.xlu1 %795 }
  0xa1   : > { %728 = vmatpush1.bf16.msra.mxu1 %v706_v42 }
  0xa3   : > { %v798_v45 = vpop.permute.xlu0 %797 }
  0xa4   : > { %1175 = vmatmul.mubr.msk.bf16.vlgmr.msra.gmra.mxu1 %vm239_vm0, %v1252_v44  ;;  %v794_v46 = vpop.permute.xlu1 %793  ;;  %v801_v47 = vsel %vm799_vm6, %v796_v43, %v798_v45 }
  0xa5   : > { %v800_v48 = vsel %vm799_vm6, %v794_v46, %v796_v43  ;;  %821 = vmatprep.subr.bf16.mxu0 %v801_v47  ;;  %933 = vmatprep.mubr.bf16.mxu1 %v1280_v0 }
  0xa6   : > { %822 = vmatpush1.bf16.msra.mxu0 %v800_v48 }
  0xa7   : > { %v890_v50 = vpop.permute.xlu0 %889 }
  0xa8   : > { %v892_v51 = vpop.permute.xlu1 %891 }
  0xa9   : > { %1182 = vmatmul.mubr.msk.bf16.vlgmr.msra.gmra.mxu0 %vm239_vm0, %v1253_v49  ;;  %v895_v52 = vsel %vm893_vm7, %v890_v50, %v892_v51 }
  0xaa   : > { %915 = vmatprep.subr.bf16.mxu1 %v895_v52  ;;  %1027 = vmatprep.mubr.bf16.mxu0 %v1280_v0 }
  0xab   : > { %v888_v53 = vpop.permute.xlu0 %887 }
  0xac   : > { %v894_v54 = vsel %vm893_vm7, %v888_v53, %v890_v50  ;;  %v984_v55 = vpop.permute.xlu1 %983 }
  0xad   : > { %916 = vmatpush1.bf16.msra.mxu1 %v894_v54 }
  0xaf   : > { %v986_v57 = vpop.permute.xlu0 %985 }
  0xb0   : > { %1189 = vmatmul.mubr.msk.bf16.vlgmr.msra.gmra.mxu1 %vm239_vm0, %v1254_v56  ;;  %v982_v58 = vpop.permute.xlu1 %981  ;;  %v989_v59 = vsel %vm987_vm8, %v984_v55, %v986_v57 }
  0xb1   : > { %v988_v60 = vsel %vm987_vm8, %v982_v58, %v984_v55  ;;  %1009 = vmatprep.subr.bf16.mxu0 %v989_v59 }
  0xb2   : > { %1010 = vmatpush1.bf16.msra.mxu0 %v988_v60 }
  0xb5   : > { %1196 = vmatmul.mubr.msk.bf16.vlgmr.msra.gmra.mxu0 %vm239_vm0, %v1255_v61 }
  0xbc   : > { %v201_v11 = vpop.permute.xlu0 %200 }
  0xbd   : > { %v206_v17 = vpop.permute.xlu1 %205 }
  0xd5   : > { %v277_v62 = vpop.f32.mrf.mxu0 }
  0xd6   : > { %v286_v14 = vadd.f32 %v277_v62, %v201_v11 }
  0xd7   : > { %v279_v63 = vpop.f32.mrf.mxu0 }
  0xd8   : > { %v287_v18 = vadd.f32 %v279_v63, %v201_v11 }
  0xd9   : > { %v281_v0 = vpop.f32.mrf.mxu0 }
  0xda   : > { %v288_v22 = vadd.f32 %v281_v0, %v206_v17 }
  0xdb   : > { %v283_v1 = vpop.f32.mrf.mxu0 }
  0xdc   : > { %v289_v28 = vadd.f32 %v283_v1, %v206_v17 }
 0x14d   : > { %v371_v2 = vpop.f32.mrf.mxu1 }
 0x14e   : > { %v380_v19 = vadd.f32 %v371_v2, %v286_v14 }
 0x14f   : > { %v373_v3 = vpop.f32.mrf.mxu1 }
 0x150   : > { %v381_v24 = vadd.f32 %v373_v3, %v287_v18 }
 0x151   : > { %v375_v4 = vpop.f32.mrf.mxu1  ;;  %v465_v5 = vpop.f32.mrf.mxu0 }
 0x152   : > { %v474_v25 = vadd.f32 %v465_v5, %v380_v19  ;;  %v382_v29 = vadd.f32 %v375_v4, %v288_v22 }
 0x153   : > { %v467_v6 = vpop.f32.mrf.mxu0  ;;  %v377_v7 = vpop.f32.mrf.mxu1 }
 0x154   : > { %v475_v31 = vadd.f32 %v467_v6, %v381_v24  ;;  %v383_v35 = vadd.f32 %v377_v7, %v289_v28 }
 0x155   : > { %v469_v8 = vpop.f32.mrf.mxu0 }
 0x156   : > { %v476_v36 = vadd.f32 %v469_v8, %v382_v29 }
 0x157   : > { %v471_v12 = vpop.f32.mrf.mxu0 }
 0x158   : > { %v559_v9 = vpop.f32.mrf.mxu1  ;;  %v477_v41 = vadd.f32 %v471_v12, %v383_v35 }
 0x159   : > { %v568_v32 = vadd.f32 %v559_v9, %v474_v25 }
 0x15a   : > { %v561_v10 = vpop.f32.mrf.mxu1 }
 0x15b   : > { %v569_v37 = vadd.f32 %v561_v10, %v475_v31 }
 0x15c   : > { %v563_v15 = vpop.f32.mrf.mxu1 }
 0x15d   : > { %v653_v13 = vpop.f32.mrf.mxu0  ;;  %v570_v42 = vadd.f32 %v563_v15, %v476_v36 }
 0x15e   : > { %v565_v20 = vpop.f32.mrf.mxu1  ;;  %v662_v38 = vadd.f32 %v653_v13, %v568_v32 }
 0x15f   : > { %v655_v16 = vpop.f32.mrf.mxu0  ;;  %v571_v46 = vadd.f32 %v565_v20, %v477_v41 }
 0x160   : > { %v663_v43 = vadd.f32 %v655_v16, %v569_v37 }
 0x161   : > { %v657_v21 = vpop.f32.mrf.mxu0 }
 0x162   : > { %v664_v47 = vadd.f32 %v657_v21, %v570_v42 }
 0x163   : > { %v659_v27 = vpop.f32.mrf.mxu0 }
 0x164   : > { %v747_v23 = vpop.f32.mrf.mxu1  ;;  %v665_v52 = vadd.f32 %v659_v27, %v571_v46 }
 0x165   : > { %v756_v44 = vadd.f32 %v747_v23, %v662_v38 }
 0x166   : > { %v749_v26 = vpop.f32.mrf.mxu1 }
 0x167   : > { %v757_v48 = vadd.f32 %v749_v26, %v663_v43 }
 0x168   : > { %v751_v33 = vpop.f32.mrf.mxu1 }
 0x169   : > { %v841_v30 = vpop.f32.mrf.mxu0  ;;  %v758_v53 = vadd.f32 %v751_v33, %v664_v47 }
 0x16a   : > { %v753_v39 = vpop.f32.mrf.mxu1  ;;  %v850_v49 = vadd.f32 %v841_v30, %v756_v44 }
 0x16b   : > { %v843_v34 = vpop.f32.mrf.mxu0  ;;  %v759_v58 = vadd.f32 %v753_v39, %v665_v52 }
 0x16c   : > { %v851_v54 = vadd.f32 %v843_v34, %v757_v48 }
 0x16d   : > { %v845_v40 = vpop.f32.mrf.mxu0 }
 0x16e   : > { %v852_v59 = vadd.f32 %v845_v40, %v758_v53 }
 0x16f   : > { %v847_v51 = vpop.f32.mrf.mxu0 }
 0x170   : > { %v935_v45 = vpop.f32.mrf.mxu1  ;;  %v853_v0 = vadd.f32 %v847_v51, %v759_v58 }
 0x171   : > { %v944_v55 = vadd.f32 %v935_v45, %v850_v49 }
 0x172   : > { %v937_v50 = vpop.f32.mrf.mxu1 }
 0x173   : > { %v945_v60 = vadd.f32 %v937_v50, %v851_v54 }
 0x174   : > { %v939_v56 = vpop.f32.mrf.mxu1 }
 0x175   : > { %v1029_v57 = vpop.f32.mrf.mxu0  ;;  %v946_v1 = vadd.f32 %v939_v56, %v852_v59 }
 0x176   : > { %v1038_v61 = vadd.f32 %v1029_v57, %v944_v55  ;;  %v941_v62 = vpop.f32.mrf.mxu1 }
 0x177   : > { %v1031_v63 = vpop.f32.mrf.mxu0  ;;  %v947_v4 = vadd.f32 %v941_v62, %v853_v0 }
 0x178   : > { %1042 = vst [vmem:[%s192_s30] sm:$0xff] %v1038_v61  ;;  %v1039_v2 = vadd.f32 %v1031_v63, %v945_v60 }
 0x179   : > { %v1033_v3 = vpop.f32.mrf.mxu0 }
 0x17a   : > { %1043 = vst [vmem:[%s192_s30 + $0x8] sm:$0xff] %v1039_v2  ;;  %v1040_v5 = vadd.f32 %v1033_v3, %v946_v1 }
 0x17b   : > { %v1035_v6 = vpop.f32.mrf.mxu0 }
 0x17c   : > { %1044 = vst [vmem:[%s192_s30 + $0x10] sm:$0xff] %v1040_v5  ;;  %v1041_v7 = vadd.f32 %v1035_v6, %v947_v4 }
 0x17e   : > { %1045 = vst [vmem:[%s192_s30 + $0x18] sm:$0xff] %v1041_v7 }
 0x17f PF: > { %s13_s14 = sadd.s32 1, %s1278_s14   ;;  %s1415_s12 = smov %s1274_s13 }
 0x180   : > { %p10_p5 = scmp.ge.s32.totalorder %s13_s14, 4   ;;  %s1416_s13 = smov %s1418_s15 }
 0x182   :  { %12 = sbr.rel (!%p10_p5) target bundleno = 2 (0x2), region = 71 }

</bundles_post_ra>
